<compile_context>
chip_gen: v6e
topology: v6e:2x2x1
jax: 0.10.0
libtpu: 0.0.40
codegen_flags: <defaults>
</compile_context>

<pallas_src>
import functools

import jax
import jax.numpy as jnp
from jax.experimental import pallas as pl
from jax.experimental.pallas import tpu as pltpu


LANE = 128          # lane padding target (classifier + hidden)
SUBLANE_F32 = 8     # sublane alignment for f32 batch tiles
TM_TARGET = 512     # preferred batch tile (mem-bound roofline sweet spot)


def _round_up(x, m):
    return ((x + m - 1) // m) * m


def _mlp_cls_kernel(x_ref, w1t_ref, b1_ref, w2t_ref, b2_ref, o_ref):
    # x arrives as f32 (cast to bf16 in-kernel -> half the input HBM traffic
    # of shipping a pre-cast bf16 copy through a separate XLA op).
    x_bf = x_ref[...].astype(jnp.bfloat16)
    # hidden = relu(x @ W1t + b1); W1t pre-transposed -> plain MXU dot.
    h = jnp.dot(x_bf, w1t_ref[...], preferred_element_type=jnp.float32)
    h = jnp.maximum(h + b1_ref[...], 0.0)                  # f32 bias/ReLU on VPU
    # logits = h @ W2t_pad + b2_pad; (TM, c_pad) lane-dense store.
    logits = jnp.dot(h.astype(w2t_ref.dtype), w2t_ref[...],
                     preferred_element_type=jnp.float32)
    o_ref[...] = (logits + b2_ref[...]).astype(o_ref.dtype)


def build_strict_classifier_params(params, num_classes):
    """Analogue of StrictClassificationOnlyModel.__init__.

    Truncates the classifier to the first `num_classes` rows, pre-transposes
    both Linear weights, casts them to bf16, and zero-pads both the hidden
    dim and the classifier output dim to multiples of 128 lanes. Done once.
    """
    c_pad = _round_up(max(num_classes, 1), LANE)

    w1 = params["w1"]                       # (hidden, in_feat)  PyTorch layout
    b1 = params["b1"]                       # (hidden,)
    w2 = params["w_cls"][:num_classes]      # truncation, as in module __init__
    b2 = params["b_cls"][:num_classes]
    hidden, in_feat = w1.shape
    h_pad = _round_up(hidden, LANE)

    w1t = jnp.zeros((in_feat, h_pad), jnp.bfloat16)
    w1t = w1t.at[:, :hidden].set(jnp.asarray(w1.T, dtype=jnp.bfloat16))
    b1r = jnp.zeros((1, h_pad), jnp.float32)
    b1r = b1r.at[0, :hidden].set(jnp.asarray(b1, dtype=jnp.float32))

    w2t = jnp.zeros((h_pad, c_pad), jnp.bfloat16)
    w2t = w2t.at[:hidden, :num_classes].set(jnp.asarray(w2.T, dtype=jnp.bfloat16))
    b2r = jnp.zeros((1, c_pad), jnp.float32)
    b2r = b2r.at[0, :num_classes].set(jnp.asarray(b2, dtype=jnp.float32))

    return {"w1t": w1t, "b1": b1r, "w2t": w2t, "b2": b2r,
            "num_classes": num_classes}


def _pick_tile(n):
    """Batch tile: target 512 rows; cap so the grid has >=2 steps (v7x
    megacore sharding); shrink + 8-align for tiny batches."""
    if n <= 16:
        return _round_up(max(n, 1), SUBLANE_F32)
    half = -(-n // 2)                       # ceil(n / 2)
    return min(TM_TARGET, _round_up(half, 16))


@functools.partial(jax.jit, static_argnames=("num_classes",))
def _forward_impl(x_nchw, w1t, b1, w2t, b2, num_classes):
    N = x_nchw.shape[0]
    x_flat = x_nchw.reshape(N, -1)          # == torch x.view(N, -1); stays f32
    in_feat = x_flat.shape[1]
    h_pad = w1t.shape[1]
    c_pad = w2t.shape[1]

    TM = _pick_tile(N)
    grid = (pl.cdiv(N, TM),)                # ragged last block masked by Pallas

    out = pl.pallas_call(
        _mlp_cls_kernel,
        out_shape=jax.ShapeDtypeStruct((N, c_pad), jnp.float32),
        grid_spec=pltpu.PrefetchScalarGridSpec(
            num_scalar_prefetch=0,
            grid=grid,
            in_specs=[
                # x tile: the only moving input, default double-buffered.
                pl.BlockSpec((TM, in_feat), lambda i: (i, 0)),
                # Resident weights/biases: constant index_map -> single buffer.
                pl.BlockSpec((in_feat, h_pad), lambda i: (0, 0),
                             pipeline_mode=pl.Buffered(1)),
                pl.BlockSpec((1, h_pad), lambda i: (0, 0),
                             pipeline_mode=pl.Buffered(1)),
                pl.BlockSpec((h_pad, c_pad), lambda i: (0, 0),
                             pipeline_mode=pl.Buffered(1)),
                pl.BlockSpec((1, c_pad), lambda i: (0, 0),
                             pipeline_mode=pl.Buffered(1)),
            ],
            out_specs=pl.BlockSpec((TM, c_pad), lambda i: (i, 0)),
        ),
        compiler_params=pltpu.CompilerParams(
            dimension_semantics=("parallel",),
            vmem_limit_bytes=64 * 1024 * 1024,
        ),
    )(x_flat, w1t, b1, w2t, b2)

    # Drop the lane padding outside the kernel (batch is un-padded now).
    return out[:, :num_classes]


def strict_classification_forward(x_nchw, prepared):
    """Forward of StrictClassificationOnlyModel: flatten -> MLP -> truncated cls."""
    return _forward_impl(x_nchw, prepared["w1t"], prepared["b1"],
                         prepared["w2t"], prepared["b2"],
                         prepared["num_classes"])


def init_params(key, in_feat, hidden, orig_classes):
    k1, k2, k3, k4 = jax.random.split(key, 4)
    w1 = jax.random.normal(k1, (hidden, in_feat), jnp.float32) * (2.0 / in_feat) ** 0.5
    b1 = jax.random.normal(k2, (hidden,), jnp.float32) * 0.01
    w_cls = jax.random.normal(k3, (orig_classes, hidden), jnp.float32) * (2.0 / hidden) ** 0.5
    b_cls = jax.random.normal(k4, (orig_classes,), jnp.float32) * 0.01
    return {"w1": w1, "b1": b1, "w_cls": w_cls, "b_cls": b_cls}


def _reference(x, params, num_classes):
    """Plain-JAX reference with the same bf16 operand quantization / f32 acc."""
    N = x.shape[0]
    x_flat = x.reshape(N, -1)
    x_bf = x_flat.astype(jnp.bfloat16).astype(jnp.float32)
    w1_bf = params["w1"].astype(jnp.bfloat16).astype(jnp.float32)
    h = jnp.maximum(x_bf @ w1_bf.T + params["b1"], 0.0)
    h_bf = h.astype(jnp.bfloat16).astype(jnp.float32)
    w2_bf = params["w_cls"][:num_classes].astype(jnp.bfloat16).astype(jnp.float32)
    return h_bf @ w2_bf.T + params["b_cls"][:num_classes]


if __name__ == "__main__":
    key = jax.random.PRNGKey(0)
    kx, kp, kx2 = jax.random.split(key, 3)

    # small CIFAR-like shapes
    N, C, H, W = 2, 4, 16, 16
    in_feat = C * H * W          # 1024
    hidden = 32
    orig_classes = 10            # classifier width of the "trained" model
    num_classes = 6              # StrictClassificationOnlyModel truncation target

    x = jax.random.normal(kx, (N, C, H, W), jnp.float32)
    params = init_params(kp, in_feat, hidden, orig_classes)

    # __init__-equivalent: truncate / transpose / pad the classifier once.
    prepared = build_strict_classifier_params(params, num_classes)

    # Case 1: tiny batch (single grid step, partial block masked).
    out = jax.block_until_ready(strict_classification_forward(x, prepared))
    ref = _reference(x, params, num_classes)
    assert out.shape == (N, num_classes)
    assert jnp.allclose(out, ref, atol=1e-2, rtol=1e-2), (
        f"max abs err {jnp.max(jnp.abs(out - ref))}")

    # Case 2: multi-step grid with a ragged last block (N % TM != 0).
    N2 = 300
    x2 = jax.random.normal(kx2, (N2, C, H, W), jnp.float32)
    out2 = jax.block_until_ready(strict_classification_forward(x2, prepared))
    ref2 = _reference(x2, params, num_classes)
    assert out2.shape == (N2, num_classes)
    assert jnp.allclose(out2, ref2, atol=1e-2, rtol=1e-2), (
        f"max abs err {jnp.max(jnp.abs(out2 - ref2))}")

    # TODO(synk): the generic nn.Module wrapping (arbitrary backbone selected by
    # cls_layer_name via getattr/setattr) has no Pallas equivalent; the backbone
    # is realized concretely as flatten -> Linear -> ReLU -> truncated Linear.

    print("KERNEL_OK")
</pallas_src>

<mosaic_0001>
module attributes {stable_mosaic.version = 11 : i64} {
  func.func @_mlp_cls_kernel(%arg0: i32, %arg1: memref<8x1024xf32, #tpu.memory_space<vmem>>, %arg2: memref<1024x128xbf16, #tpu.memory_space<vmem>>, %arg3: memref<1x128xf32, #tpu.memory_space<vmem>>, %arg4: memref<128x128xbf16, #tpu.memory_space<vmem>>, %arg5: memref<1x128xf32, #tpu.memory_space<vmem>>, %arg6: memref<8x128xf32, #tpu.memory_space<vmem>>) attributes {dimension_semantics = [#tpu.dimension_semantics<parallel>], iteration_bounds = array<i64: 1>, scalar_prefetch = 0 : i64, scratch_operands = 0 : i64, tpu.core_type = #tpu.core_type<tc>, window_params = [{transform_indices = @transform_0, window_bounds = array<i64: 8, 1024>}, {pipeline_mode = #tpu.pipeline_mode<synchronous>, transform_indices = @transform_1, window_bounds = array<i64: 1024, 128>}, {pipeline_mode = #tpu.pipeline_mode<synchronous>, transform_indices = @transform_2, window_bounds = array<i64: 1, 128>}, {pipeline_mode = #tpu.pipeline_mode<synchronous>, transform_indices = @transform_3, window_bounds = array<i64: 128, 128>}, {pipeline_mode = #tpu.pipeline_mode<synchronous>, transform_indices = @transform_4, window_bounds = array<i64: 1, 128>}, {transform_indices = @transform_5, window_bounds = array<i64: 8, 128>}]} {
    %c0 = arith.constant 0 : index
    %c0_0 = arith.constant 0 : index
    %0 = vector.load %arg1[%c0, %c0_0] : memref<8x1024xf32, #tpu.memory_space<vmem>>, vector<8x1024xf32>
    %1 = arith.truncf %0 : vector<8x1024xf32> to vector<8x1024xbf16>
    %c0_1 = arith.constant 0 : index
    %c0_2 = arith.constant 0 : index
    %2 = vector.load %arg2[%c0_1, %c0_2] : memref<1024x128xbf16, #tpu.memory_space<vmem>>, vector<1024x128xbf16>
    %cst = arith.constant dense<0.000000e+00> : vector<8x128xf32>
    %3 = tpu.matmul %1, %2, %cst {dimension_numbers = #tpu.dot_dimension_numbers<[1], [0], [0], [1], [0, 0, 1, 1], [], []>} : vector<8x1024xbf16>, vector<1024x128xbf16>, vector<8x128xf32> -> vector<8x128xf32>
    %c0_3 = arith.constant 0 : index
    %c0_4 = arith.constant 0 : index
    %4 = vector.load %arg3[%c0_3, %c0_4] : memref<1x128xf32, #tpu.memory_space<vmem>>, vector<1x128xf32>
    %5 = vector.broadcast %4 : vector<1x128xf32> to vector<8x128xf32>
    %6 = arith.addf %3, %5 : vector<8x128xf32>
    %cst_5 = arith.constant 0.000000e+00 : f32
    %7 = vector.broadcast %cst_5 : f32 to vector<8x128xf32>
    %8 = arith.maximumf %6, %7 : vector<8x128xf32>
    %9 = arith.truncf %8 : vector<8x128xf32> to vector<8x128xbf16>
    %c0_6 = arith.constant 0 : index
    %c0_7 = arith.constant 0 : index
    %10 = vector.load %arg4[%c0_6, %c0_7] : memref<128x128xbf16, #tpu.memory_space<vmem>>, vector<128x128xbf16>
    %cst_8 = arith.constant dense<0.000000e+00> : vector<8x128xf32>
    %11 = tpu.matmul %9, %10, %cst_8 {dimension_numbers = #tpu.dot_dimension_numbers<[1], [0], [0], [1], [0, 0, 1, 1], [], []>} : vector<8x128xbf16>, vector<128x128xbf16>, vector<8x128xf32> -> vector<8x128xf32>
    %c0_9 = arith.constant 0 : index
    %c0_10 = arith.constant 0 : index
    %12 = vector.load %arg5[%c0_9, %c0_10] : memref<1x128xf32, #tpu.memory_space<vmem>>, vector<1x128xf32>
    %13 = vector.broadcast %12 : vector<1x128xf32> to vector<8x128xf32>
    %14 = arith.addf %11, %13 : vector<8x128xf32>
    %c0_11 = arith.constant 0 : index
    %c0_12 = arith.constant 0 : index
    %15 = vector.load %arg6[%c0_11, %c0_12] : memref<8x128xf32, #tpu.memory_space<vmem>>, vector<8x128xf32>
    tpu.vector_store %arg6[%c0_11, %c0_12], %14 {strides = array<i32>} : memref<8x128xf32, #tpu.memory_space<vmem>>, vector<8x128xf32>,
    return
  }
  func.func @transform_0(%arg0: i32) -> (i32, i32) {
    %c0_i32 = arith.constant 0 : i32
    %c0_i32_0 = arith.constant 0 : i32
    return %arg0, %c0_i32 : i32, i32
  }
  func.func @transform_1(%arg0: i32) -> (i32, i32) {
    %c0_i32 = arith.constant 0 : i32
    %c0_i32_0 = arith.constant 0 : i32
    %c0_i32_1 = arith.constant 0 : i32
    return %c0_i32, %c0_i32_0 : i32, i32
  }
  func.func @transform_2(%arg0: i32) -> (i32, i32) {
    %c0_i32 = arith.constant 0 : i32
    %c0_i32_0 = arith.constant 0 : i32
    %c0_i32_1 = arith.constant 0 : i32
    return %c0_i32, %c0_i32_0 : i32, i32
  }
  func.func @transform_3(%arg0: i32) -> (i32, i32) {
    %c0_i32 = arith.constant 0 : i32
    %c0_i32_0 = arith.constant 0 : i32
    %c0_i32_1 = arith.constant 0 : i32
    return %c0_i32, %c0_i32_0 : i32, i32
  }
  func.func @transform_4(%arg0: i32) -> (i32, i32) {
    %c0_i32 = arith.constant 0 : i32
    %c0_i32_0 = arith.constant 0 : i32
    %c0_i32_1 = arith.constant 0 : i32
    return %c0_i32, %c0_i32_0 : i32, i32
  }
  func.func @transform_5(%arg0: i32) -> (i32, i32) {
    %c0_i32 = arith.constant 0 : i32
    %c0_i32_0 = arith.constant 0 : i32
    return %arg0, %c0_i32 : i32, i32
  }
}

</mosaic_0001>

<bundles_post_ra>
// kernel: _forward_impl.1
= control target key start
LH: loop header
LB: loop body
LE: loop exit
PB: predicated region body
PF: predicated region fallthrough
CT: control target
= control target key end

     0   :  { %10 = vsyncpa [#allocation3], 0  ;;  %s1387_s0 = inlined_call_operand.vmem [shape: f32[2,1024], index: 0, kind: input, shape index: {}]   ;;  %s1388_s1 = inlined_call_operand.hbm [shape: bf16[1024,128], index: 1, kind: input, shape index: {}]   ;;  %s1389_s2 = inlined_call_operand.vmem [shape: f32[1,128], index: 2, kind: input, shape index: {}]   ;;  %s1390_s3 = inlined_call_operand.vmem [shape: bf16[128,128], index: 3, kind: input, shape index: {}]   ;;  %s1391_s4 = inlined_call_operand.vmem [shape: f32[1,128], index: 4, kind: input, shape index: {}]   ;;  %s1392_s5 = inlined_call_operand.hbm [shape: f32[2,128], index: 5, kind: output, shape index: {}]  }
   0x1   :  { %11 = vsyncpa [#allocation4], 0  ;;  %s1278_s18 = smov [#allocation2]  }
   0x2   :  { %s19_s19 = sshll.u32 %s1278_s18, 4  ;;  %s20_s19 = int_to_ptr.vmem [resolvable:$true] %s19_s19 }
   0x3   :  { %s1242_s20 = scalar_lea.vmem %s20_s19, 8192  ;;  %p1247_p1 = scmp.lt.s32.totalorder %s20_s19, %s20_s19 }
   0x4   :  { %p1243_p0 = scmp.ne.s32.totalorder %s20_s19, %s1242_s20  ;;  %p1248_p2 = scmp.lt.s32.totalorder %s1242_s20, %s1242_s20 }
   0x6   :  { %p1249_p3 = por %p1248_p2, %p1247_p1 }
   0x8   :  { %p1250_p4 = pnand %p1249_p3, %p1243_p0 }
   0xa   :  { %1253 = shalt.err (!%p1250_p4)
}
   0xb   :  { %s1279_s21 = smov 64   ;;  %s1280_s22 = smov 4  }
   0xc   :  { %25 = dma.hbm_to_vmem [thread:$0]  %s1388_s1, 8192, %s20_s19, [#allocation3], %s1279_s21, %s1279_s21, %s1280_s22  }
   0xd   :  { %1274 = dma.done.wait [#allocation3], 8192  }
   0xe   :  { %1275 = vsyncadd [#allocation3], 4294959104  ;;  %v1150_v0 = vld [vmem:[#allocation2 + $0x78] sm:$0xff]   ;;  %v1154_v4 = vld [vmem:[#allocation2 + $0x70] sm:$0xff]   ;;  %v1281_v24 = vmov 1983009808   ;;  %v59_v26 = vlaneseq }
   0xf   :  { %v1151_v1 = vld [vmem:[#allocation2 + $0xf8] sm:$0xff]   ;;  %1024 = vmatprep.subr.bf16.mxu0 %v1150_v0  ;;  %v1155_v5 = vld [vmem:[#allocation2 + $0xf0] sm:$0xff]   ;;  %v1158_v8 = vld [vmem:[#allocation2 + $0x68] sm:$0xff]   ;;  %v57_v25 = vunpack.c.l.s4 %v1281_v24  ;;  %vm1283_vm0 = vmmov 0  }
  0x10   :  { %v1152_v2 = vld [vmem:[#allocation2 + $0x38] sm:$0xff]   ;;  %1046 = vmatprep.subr.bf16.mxu1 %v1151_v1  ;;  %v1156_v6 = vld [vmem:[#allocation2 + $0x30] sm:$0xff]   ;;  %v1159_v9 = vld [vmem:[#allocation2 + $0xe8] sm:$0xff]   ;;  %v60_v32 = vshrl.u32 %v59_v26, 7 }
  0x11   :  { %v1153_v3 = vld [vmem:[#allocation2 + $0xb8] sm:$0xff]   ;;  %1025 = vmatpush3.bf16.msra.mxu0 %v1152_v2  ;;  %v1157_v7 = vld [vmem:[#allocation2 + $0xb0] sm:$0xff]   ;;  %v1160_v10 = vld [vmem:[#allocation2 + $0x28] sm:$0xff]   ;;  %v58_v31 = vunpack.c.0.s8 %v57_v25 }
  0x12   :  { %1047 = vmatpush3.bf16.msra.mxu1 %v1153_v3  ;;  %1026 = vmatprep.subr.bf16.mxu0 %v1154_v4  ;;  %v1161_v11 = vld [vmem:[#allocation2 + $0xa8] sm:$0xff]   ;;  %v1162_v12 = vld [vmem:[#allocation2 + $0x60] sm:$0xff]   ;;  %v1166_v16 = vld [vmem:[#allocation2 + $0x58] sm:$0xff]  }
  0x13   :  { %1048 = vmatprep.subr.bf16.mxu1 %v1155_v5  ;;  %v1163_v13 = vld [vmem:[#allocation2 + $0xe0] sm:$0xff]   ;;  %v1167_v17 = vld [vmem:[#allocation2 + $0xd8] sm:$0xff]   ;;  %v1170_v20 = vld [vmem:[#allocation2 + $0x50] sm:$0xff]   ;;  %v1320_v37 = vsub.s32 %v58_v31, %v60_v32 }
  0x14   :  { %v1164_v14 = vld [vmem:[#allocation2 + $0x20] sm:$0xff]   ;;  %v1168_v18 = vld [vmem:[#allocation2 + $0x18] sm:$0xff]   ;;  %v1171_v21 = vld [vmem:[#allocation2 + $0xd0] sm:$0xff]  }
  0x15   :  { %1027 = vmatpush3.bf16.msra.mxu0 %v1156_v6  ;;  %v1165_v15 = vld [vmem:[#allocation2 + $0xa0] sm:$0xff]   ;;  %v1169_v19 = vld [vmem:[#allocation2 + $0x98] sm:$0xff]   ;;  %v1172_v22 = vld [vmem:[#allocation2 + $0x10] sm:$0xff]  }
  0x16   :  { %1049 = vmatpush3.bf16.msra.mxu1 %v1157_v7  ;;  %1028 = vmatprep.subr.bf16.mxu0 %v1158_v8  ;;  %v1173_v23 = vld [vmem:[#allocation2 + $0x90] sm:$0xff]   ;;  %v1174_v27 = vld [vmem:[#allocation2 + $0x48] sm:$0xff]   ;;  %v1178_v33 = vld [vmem:[#allocation2 + $0x40] sm:$0xff]  }
  0x17   :  { %1050 = vmatprep.subr.bf16.mxu1 %v1159_v9  ;;  %v1175_v28 = vld [vmem:[#allocation2 + $0xc8] sm:$0xff]   ;;  %v1179_v34 = vld [vmem:[#allocation2 + $0xc0] sm:$0xff]   ;;  %v1188_v44 = vld [vmem:[#allocation2 + $0x178] sm:$0xff]  }
  0x18   :  { %v1176_v29 = vld [vmem:[#allocation2 + $0x8] sm:$0xff]   ;;  %v1180_v35 = vld [vmem:[#allocation2] sm:$0xff]   ;;  %v1189_v47 = vld [vmem:[#allocation2 + $0x1f8] sm:$0xff]  }
  0x19   :  { %1029 = vmatpush3.bf16.msra.mxu0 %v1160_v10  ;;  %v1177_v30 = vld [vmem:[#allocation2 + $0x88] sm:$0xff]   ;;  %v1181_v36 = vld [vmem:[#allocation2 + $0x80] sm:$0xff]   ;;  %v1190_v50 = vld [vmem:[#allocation2 + $0x138] sm:$0xff]  }
  0x1a   :  { %1051 = vmatpush3.bf16.msra.mxu1 %v1161_v11  ;;  %1030 = vmatprep.subr.bf16.mxu0 %v1162_v12  ;;  %v1182_v38 = vld [vmem:[%s1387_s0] ss:$16 sps:$4 sm:$0xff]   ;;  %v1186_v40 = vld [vmem:[%s1387_s0 + $0x4] ss:$16 sps:$4 sm:$0xff]   ;;  %v1191_v53 = vld [vmem:[#allocation2 + $0x1b8] sm:$0xff]  }
  0x1b   :  { %1052 = vmatprep.subr.bf16.mxu1 %v1163_v13  ;;  %v1184_v39 = vld [vmem:[%s1387_s0 + $0x20] ss:$16 sps:$4 sm:$0xff]   ;;  %v1187_v41 = vld [vmem:[%s1387_s0 + $0x24] ss:$16 sps:$4 sm:$0xff]   ;;  %v62_v42 = vrot.slane %v1182_v38, %v1320_v37  ;;  %v69_v45 = vrot.slane %v1186_v40, %v1320_v37  ;;  %v1196_v62 = vld [vmem:[#allocation2 + $0x168] sm:$0xff]   ;;  %v1282_v40 = vmov 0.0  }
  0x1c   :  { %v76_v43 = vrot.slane %v1184_v39, %v1320_v37  ;;  %v83_v46 = vrot.slane %v1187_v41, %v1320_v37  ;;  %v1192_v56 = vld [vmem:[#allocation2 + $0x170] sm:$0xff]   ;;  %v1197_v63 = vld [vmem:[#allocation2 + $0x1e8] sm:$0xff]   ;;  %v1200_v2 = vld [vmem:[#allocation2 + $0x160] sm:$0xff]  }
  0x1d   :  { %1031 = vmatpush3.bf16.msra.mxu0 %v1164_v14  ;;  %v1193_v59 = vld [vmem:[#allocation2 + $0x1f0] sm:$0xff]   ;;  %v1198_v0 = vld [vmem:[#allocation2 + $0x128] sm:$0xff]   ;;  %v1201_v3 = vld [vmem:[#allocation2 + $0x1e0] sm:$0xff]  }
  0x1e   :  { %1053 = vmatpush3.bf16.msra.mxu1 %v1165_v15  ;;  %1032 = vmatprep.subr.bf16.mxu0 %v1166_v16  ;;  %v85_v48 = vcombine.high %v62_v42, %v76_v43  ;;  %v84_v49 = vcombine.low %v62_v42, %v76_v43  ;;  %v87_v51 = vcombine.high %v69_v45, %v83_v46  ;;  %v1194_v60 = vld [vmem:[#allocation2 + $0x130] sm:$0xff]   ;;  %v1199_v1 = vld [vmem:[#allocation2 + $0x1a8] sm:$0xff]   ;;  %v1202_v4 = vld [vmem:[#allocation2 + $0x120] sm:$0xff]  }
  0x1f   :  { %1054 = vmatprep.subr.bf16.mxu1 %v1167_v17  ;;  %v86_v52 = vcombine.low %v69_v45, %v83_v46  ;;  %v1195_v61 = vld [vmem:[#allocation2 + $0x1b0] sm:$0xff]   ;;  %v1203_v5 = vld [vmem:[#allocation2 + $0x1a0] sm:$0xff]   ;;  %v1204_v6 = vld [vmem:[#allocation2 + $0x158] sm:$0xff]  }
  0x20   :  { %v133_v54 = vpack.c.bf16 %v85_v48, %v85_v48  ;;  %v132_v55 = vpack.c.bf16 %v84_v49, %v84_v49  ;;  %v135_v57 = vpack.c.bf16 %v87_v51, %v87_v51  ;;  %v1205_v7 = vld [vmem:[#allocation2 + $0x1d8] sm:$0xff]   ;;  %v1208_v10 = vld [vmem:[#allocation2 + $0x150] sm:$0xff]   ;;  %v1212_v14 = vld [vmem:[#allocation2 + $0x148] sm:$0xff]  }
  0x21   :  { %1033 = vmatpush3.bf16.msra.mxu0 %v1168_v18  ;;  %v134_v58 = vpack.c.bf16 %v86_v52, %v86_v52  ;;  %v1206_v8 = vld [vmem:[#allocation2 + $0x118] sm:$0xff]   ;;  %v1209_v11 = vld [vmem:[#allocation2 + $0x1d0] sm:$0xff]   ;;  %v1213_v15 = vld [vmem:[#allocation2 + $0x1c8] sm:$0xff]  }
  0x22   :  { %1055 = vmatpush3.bf16.msra.mxu1 %v1169_v19  ;;  %1034 = vmatprep.subr.bf16.mxu0 %v1170_v20  ;;  %v1207_v9 = vld [vmem:[#allocation2 + $0x198] sm:$0xff]   ;;  %v1210_v12 = vld [vmem:[#allocation2 + $0x110] sm:$0xff]   ;;  %v1214_v16 = vld [vmem:[#allocation2 + $0x108] sm:$0xff]  }
  0x23   :  { %1056 = vmatprep.subr.bf16.mxu1 %v1171_v21  ;;  %691 = vmatprep.mubr.bf16.mxu0 %v133_v54  ;;  %v1211_v13 = vld [vmem:[#allocation2 + $0x190] sm:$0xff]   ;;  %v1215_v17 = vld [vmem:[#allocation2 + $0x188] sm:$0xff]   ;;  %v1216_v18 = vld [vmem:[#allocation2 + $0x140] sm:$0xff]  }
  0x24   :  { %731 = vmatprep.mubr.bf16.mxu1 %v135_v57  ;;  %v1217_v19 = vld [vmem:[#allocation2 + $0x1c0] sm:$0xff]   ;;  %v1224_v24 = vld [vmem:[%s1387_s0 + $0xc] ss:$16 sps:$4 sm:$0xff]  }
  0x25   :  { %1035 = vmatpush3.bf16.msra.mxu0 %v1172_v22  ;;  %v1218_v20 = vld [vmem:[#allocation2 + $0x100] sm:$0xff]   ;;  %v1220_v22 = vld [vmem:[%s1387_s0 + $0x8] ss:$16 sps:$4 sm:$0xff]   ;;  %v1225_v25 = vld [vmem:[%s1387_s0 + $0x2c] ss:$16 sps:$4 sm:$0xff]  }
  0x26   :  { %1057 = vmatpush3.bf16.msra.mxu1 %v1173_v23  ;;  %1036 = vmatprep.subr.bf16.mxu0 %v1174_v27  ;;  %v1219_v21 = vld [vmem:[#allocation2 + $0x180] sm:$0xff]   ;;  %v1222_v23 = vld [vmem:[%s1387_s0 + $0x28] ss:$16 sps:$4 sm:$0xff]   ;;  %v98_v26 = vrot.slane %v1220_v22, %v1320_v37 }
  0x27   :  { %1058 = vmatprep.subr.bf16.mxu1 %v1175_v28  ;;  %v112_v27 = vrot.slane %v1222_v23, %v1320_v37  ;;  %v105_v28 = vrot.slane %v1224_v24, %v1320_v37  ;;  %v1226_v39 = vld [vmem:[%s1390_s3 + $0x38] sm:$0xff]   ;;  %v1228_v41 = vld [vmem:[%s1390_s3 + $0x28] sm:$0xff]   ;;  %v1229_v42 = vld [vmem:[%s1390_s3 + $0x20] sm:$0xff]  }
  0x28   :  { %v1230_v43 = vld [vmem:[%s1390_s3 + $0x18] sm:$0xff]   ;;  %v1232_v45 = vld [vmem:[%s1390_s3 + $0x8] sm:$0xff]   ;;  %v1233_v46 = vld [vmem:[%s1390_s3] sm:$0xff]  }
  0x29   :  { %1037 = vmatpush3.bf16.msra.mxu0 %v1176_v29  ;;  %v119_v29 = vrot.slane %v1225_v25, %v1320_v37  ;;  %v120_v31 = vcombine.low %v98_v26, %v112_v27  ;;  %v1227_v37 = vld [vmem:[%s1390_s3 + $0x30] sm:$0xff]  }
  0x2a   :  { %1059 = vmatpush3.bf16.msra.mxu1 %v1177_v30  ;;  %1038 = vmatprep.subr.bf16.mxu0 %v1178_v33  ;;  %v121_v30 = vcombine.high %v98_v26, %v112_v27 }
  0x2b   :  { %1060 = vmatprep.subr.bf16.mxu1 %v1179_v34  ;;  %v123_v32 = vcombine.high %v105_v28, %v119_v29  ;;  %v122_v33 = vcombine.low %v105_v28, %v119_v29 }
  0x2c   :  { %v137_v34 = vpack.c.bf16 %v121_v30, %v121_v30 }
  0x2d   :  { %1039 = vmatpush3.bf16.msra.mxu0 %v1180_v35  ;;  %v136_v35 = vpack.c.bf16 %v120_v31, %v120_v31  ;;  %v138_v38 = vpack.c.bf16 %v122_v33, %v122_v33 }
  0x2e   :  { %1061 = vmatpush3.bf16.msra.mxu1 %v1181_v36  ;;  %1068 = vmatprep.subr.bf16.mxu0 %v1188_v44  ;;  %v139_v36 = vpack.c.bf16 %v123_v32, %v123_v32  ;;  %v1231_v44 = vld [vmem:[%s1390_s3 + $0x10] sm:$0xff]  }
  0x2f   :  { %1090 = vmatprep.subr.bf16.mxu1 %v1189_v47 }
  0x30   :  { %692 = vmatmul.mubr.bf16.vlgmr.msra.gmra.mxu0 %v132_v55 }
  0x31   :  { %732 = vmatmul.mubr.bf16.vlgmr.msra.gmra.mxu1 %v134_v58  ;;  %1069 = vmatpush3.bf16.msra.mxu0 %v1190_v50 }
  0x32   :  { %1091 = vmatpush3.bf16.msra.mxu1 %v1191_v53  ;;  %1070 = vmatprep.subr.bf16.mxu0 %v1192_v56  ;;  %v950_v56 = vld [vmem:[%s1389_s2] ss:$0 sm:$0xff] }
  0x33   :  { %1092 = vmatprep.subr.bf16.mxu1 %v1193_v59  ;;  %771 = vmatprep.mubr.bf16.mxu0 %v137_v34 }
  0x34   :  { %811 = vmatprep.mubr.bf16.mxu1 %v139_v36 }
  0x35   :  { %1071 = vmatpush3.bf16.msra.mxu0 %v1194_v60 }
  0x36   :  { %1093 = vmatpush3.bf16.msra.mxu1 %v1195_v61  ;;  %1072 = vmatprep.subr.bf16.mxu0 %v1196_v62 }
  0x37   :  { %1094 = vmatprep.subr.bf16.mxu1 %v1197_v63 }
  0x39   :  { %1073 = vmatpush3.bf16.msra.mxu0 %v1198_v0 }
  0x3a   :  { %1095 = vmatpush3.bf16.msra.mxu1 %v1199_v1  ;;  %1074 = vmatprep.subr.bf16.mxu0 %v1200_v2 }
  0x3b   :  { %1096 = vmatprep.subr.bf16.mxu1 %v1201_v3 }
  0x3d   :  { %1075 = vmatpush3.bf16.msra.mxu0 %v1202_v4 }
  0x3e   :  { %1097 = vmatpush3.bf16.msra.mxu1 %v1203_v5  ;;  %1076 = vmatprep.subr.bf16.mxu0 %v1204_v6 }
  0x3f   :  { %1098 = vmatprep.subr.bf16.mxu1 %v1205_v7 }
  0x41   :  { %1077 = vmatpush3.bf16.msra.mxu0 %v1206_v8 }
  0x42   :  { %1099 = vmatpush3.bf16.msra.mxu1 %v1207_v9  ;;  %1078 = vmatprep.subr.bf16.mxu0 %v1208_v10  ;;  %v1015_v10 = vld [vmem:[%s1391_s4] ss:$0 sm:$0xff] }
  0x43   :  { %1100 = vmatprep.subr.bf16.mxu1 %v1209_v11 }
  0x45   :  { %1079 = vmatpush3.bf16.msra.mxu0 %v1210_v12 }
  0x46   :  { %1101 = vmatpush3.bf16.msra.mxu1 %v1211_v13  ;;  %1080 = vmatprep.subr.bf16.mxu0 %v1212_v14 }
  0x47   :  { %1102 = vmatprep.subr.bf16.mxu1 %v1213_v15 }
  0x49   :  { %1081 = vmatpush3.bf16.msra.mxu0 %v1214_v16 }
  0x4a   :  { %1103 = vmatpush3.bf16.msra.mxu1 %v1215_v17  ;;  %1082 = vmatprep.subr.bf16.mxu0 %v1216_v18 }
  0x4b   :  { %1104 = vmatprep.subr.bf16.mxu1 %v1217_v19 }
  0x4d   :  { %1083 = vmatpush3.bf16.msra.mxu0 %v1218_v20 }
  0x4e   :  { %1105 = vmatpush3.bf16.msra.mxu1 %v1219_v21  ;;  %1121 = vmatprep.subr.bf16.mxu0 %v1282_v40 }
  0x50   :  { %772 = vmatmul.mubr.bf16.vlgmr.msra.gmra.mxu0 %v136_v35 }
  0x51   :  { %812 = vmatmul.mubr.bf16.vlgmr.msra.gmra.mxu1 %v138_v38  ;;  %1122 = vmatpush3.bf16.msra.mxu0 %v1226_v39 }
  0x52   :  { %1123 = vmatprep.subr.bf16.mxu0 %v1282_v40  ;;  %1137 = vmatprep.mubr.msk.bf16.mxu0 %vm1283_vm0, %v1282_v40 }
  0x55   :  { %1124 = vmatpush3.bf16.msra.mxu0 %v1227_v37 }
  0x56   :  { %1125 = vmatprep.subr.bf16.mxu0 %v1282_v40 }
  0x59   :  { %1126 = vmatpush3.bf16.msra.mxu0 %v1228_v41 }
  0x5a   :  { %1127 = vmatprep.subr.bf16.mxu0 %v1282_v40 }
  0x5d   :  { %1128 = vmatpush3.bf16.msra.mxu0 %v1229_v42 }
  0x5e   :  { %1129 = vmatprep.subr.bf16.mxu0 %v1282_v40 }
  0x61   :  { %1130 = vmatpush3.bf16.msra.mxu0 %v1230_v43 }
  0x62   :  { %1131 = vmatprep.subr.bf16.mxu0 %v1282_v40 }
  0x65   :  { %1132 = vmatpush3.bf16.msra.mxu0 %v1231_v44 }
  0x66   :  { %1133 = vmatprep.subr.bf16.mxu0 %v1282_v40 }
  0x69   :  { %1134 = vmatpush3.bf16.msra.mxu0 %v1232_v45 }
  0x6a   :  { %1135 = vmatprep.subr.bf16.mxu0 %v1282_v40 }
  0x6d   :  { %1136 = vmatpush3.bf16.msra.mxu0 %v1233_v46 }
  0xf0   :  { %v1040_v47 = vpop.f32.mrf.mxu0 }
  0xf1   :  { %v1062_v48 = vpop.f32.mrf.mxu1 }
  0xf2   :  { %v1041_v49 = vpop.f32.mrf.mxu0 }
  0xf3   :  { %v1063_v50 = vpop.f32.mrf.mxu1  ;;  %v1042_v55 = vadd.f32 %v1041_v49, %v1040_v47 }
  0xf4   :  { %v1043_v51 = vpop.f32.mrf.mxu0  ;;  %v1064_v58 = vadd.f32 %v1063_v50, %v1062_v48 }
  0xf5   :  { %v1065_v52 = vpop.f32.mrf.mxu1  ;;  %v694_v57 = vadd.f32 %v1042_v55, %v950_v56 }
  0xf6   :  { %v1044_v53 = vpop.f32.mrf.mxu0 }
  0xf7   :  { %v1066_v54 = vpop.f32.mrf.mxu1  ;;  %v734_v62 = vadd.f32 %v1064_v58, %v694_v57 }
 0x110   :  { %v1084_v59 = vpop.f32.mrf.mxu0 }
 0x111   :  { %v1106_v60 = vpop.f32.mrf.mxu1 }
 0x112   :  { %v1085_v61 = vpop.f32.mrf.mxu0 }
 0x113   :  { %v1086_v63 = vadd.f32 %v1085_v61, %v1084_v59  ;;  %v1107_v0 = vpop.f32.mrf.mxu1 }
 0x114   :  { %v1087_v1 = vpop.f32.mrf.mxu0  ;;  %v1108_v3 = vadd.f32 %v1107_v0, %v1106_v60 }
 0x115   :  { %v774_v2 = vadd.f32 %v1086_v63, %v734_v62  ;;  %v1109_v4 = vpop.f32.mrf.mxu1 }
 0x116   :  { %v1088_v5 = vpop.f32.mrf.mxu0 }
 0x117   :  { %v814_v6 = vadd.f32 %v1108_v3, %v774_v2  ;;  %v1110_v7 = vpop.f32.mrf.mxu1 }
 0x119   :  { %v819_v8 = vmax.f32 %v814_v6, 0.0 }
 0x11b   :  { %v820_v9 = vpack.c.bf16 %v819_v8, %v819_v8 }
 0x11d   :  { %1138 = vmatmul.mubr.bf16.vlgmr.msra.gmra.mxu0 %v820_v9 }
 0x1dd   :  { %v926_v11 = vpop.f32.mrf.mxu0 }
 0x1de   :  { %v927_v12 = vadd.f32 %v1015_v10, %v926_v11 }
 0x1df   :  { %v1139_v13 = vpop.f32.mrf.mxu0 }
 0x1e0   :  { %932 = vst [vmem:[#allocation5] sm:$0xff] %v927_v12 }
 0x1e1   :  { %v929_v14 = vpop.f32.mrf.mxu0 }
 0x1e3   :  { %v1140_v15 = vpop.f32.mrf.mxu0 }
 0x1e4   :  { %937 = vsyncadd [#allocation4], 96  ;;  %s1284_s6 = smov [#allocation5]  }
 0x1e5   :  { %s938_s7 = sshll.u32 %s1284_s6, 4  ;;  %s939_s7 = int_to_ptr.vmem [resolvable:$true] %s938_s7 }
 0x1e6   :  { %s1254_s8 = scalar_lea.vmem %s939_s7, 32  ;;  %s1258_s9 = scalar_lea.vmem %s939_s7, 128 }
 0x1e7   :  { %p1255_p5 = scmp.ne.s32.totalorder %s939_s7, %s1254_s8  ;;  %p1259_p6 = scmp.lt.s32.totalorder %s939_s7, %s939_s7 }
 0x1e8   :  { %p1260_p7 = scmp.lt.s32.totalorder %s1258_s9, %s1254_s8 }
 0x1ea   :  { %p1261_p8 = por %p1260_p7, %p1259_p6 }
 0x1ec   :  { %p1262_p9 = pnand %p1261_p8, %p1255_p5 }
 0x1ee   :  { %1265 = shalt.err (!%p1262_p9)
}
 0x1ef   :  { %s1285_s10 = smov 32   ;;  %s1286_s4 = smov 2  }
 0x1f0   :  { %944 = dma.vmem_to_hbm [thread:$0]  %s939_s7, 32, %s1392_s5, [#allocation4], %s1285_s10, %s1285_s10, %s1286_s4  }
 0x1f1   :  { %1276 = dma.done.wait [#allocation4], 128  }
 0x1f2   :  { %1277 = vsyncadd [#allocation4], 4294967168 }
 0x1f3   :  { %948 = vsyncpa [#allocation3], 1 }
 0x1f4   :  { %949 = vsyncpa [#allocation4], 1 }

</bundles_post_ra>
